<compile_context>
chip_gen: v7x
topology: tpu7x:2x2x1
jax: 0.10.0
libtpu: 0.0.40
codegen_flags: <defaults>
</compile_context>

<pallas_src>
import functools

import jax
import jax.numpy as jnp
from jax.experimental import pallas as pl
from jax.experimental.pallas import tpu as pltpu


def _round_up(x, m):
    return ((x + m - 1) // m) * m


def _lane_pad(n):
    # Last-dim VMEM footprint rounds up to a multiple of 128 lanes.
    return _round_up(n, 128)


# ---------------------------------------------------------------------------
# Fused kernel (small problems): matmul -> BN stats -> affine -> ReLU in one call.
#   p_ref (Rg, Kg)  w_ref (Kg, L)  gamma/beta (1, L)  a_ref (L, L) same-channel 0/1
#   o_ref (Rg, L)
# ---------------------------------------------------------------------------
def _fused_convt_bn_relu_kernel(p_ref, w_ref, gamma_ref, beta_ref, a_ref, o_ref,
                                *, inv_cnt, eps):
    # Sub-pixel transposed-conv matmul, f32 accumulation on the MXU.
    y = jnp.dot(p_ref[...], w_ref[...], preferred_element_type=jnp.float32)
    # Per-lane sums (lane l belongs to channel l % Cout); padded rows are zero.
    s1 = jnp.sum(y, axis=0, keepdims=True)           # (1, L)
    s2 = jnp.sum(y * y, axis=0, keepdims=True)       # (1, L)
    # Cross-lane -> per-channel reduction (broadcast back to lanes) via a tiny
    # same-channel 0/1 matmul; MXU is idle in this mem-bound regime so it's free.
    ch1 = jnp.dot(s1, a_ref[...], preferred_element_type=jnp.float32)
    ch2 = jnp.dot(s2, a_ref[...], preferred_element_type=jnp.float32)
    mean = ch1 * inv_cnt
    # Biased variance (PyTorch BN training-mode normalization).
    var = jnp.maximum(ch2 * inv_cnt - mean * mean, 0.0)
    inv = gamma_ref[...] * jax.lax.rsqrt(var + eps)
    shift = beta_ref[...] - mean * inv
    o_ref[...] = jnp.maximum(y * inv + shift, 0.0)


# ---------------------------------------------------------------------------
# Tiled kernel (large problems): matmul + per-tile BN partial sums.
#   y is written in y_ref.dtype (bf16 by default); the stats come from the f32
#   accumulator, so BN statistics are unaffected by the narrow store.
# ---------------------------------------------------------------------------
def _convt_matmul_stats_kernel(p_ref, w_ref, y_ref, st_ref):
    y = jnp.dot(p_ref[...], w_ref[...], preferred_element_type=jnp.float32)
    y_ref[...] = y.astype(y_ref.dtype)
    # Direct stores (no concatenate/reshape relayout of the stats vregs).
    st_ref[0, 0:1, :] = jnp.sum(y, axis=0, keepdims=True)
    st_ref[0, 1:2, :] = jnp.sum(y * y, axis=0, keepdims=True)


# ---------------------------------------------------------------------------
# Wrapper: ConvTranspose2d(bias=False) -> BatchNorm2d (train stats) -> ReLU
# ---------------------------------------------------------------------------
def upsample_forward(x_nchw, w, gamma, beta, *, stride, padding, eps=1e-5,
                     matmul_dtype=jnp.bfloat16, y_dtype=jnp.bfloat16,
                     tile_rows=4096, force_tiled=False):
    """x: (N,Cin,H,W); w: (Cin,Cout,K,K) PyTorch ConvTranspose2d layout;
    gamma/beta: (Cout,). Returns (N, Cout, Ho, Wo) float32."""
    N, Cin, H, W = x_nchw.shape
    Cin_w, Cout, K, K2 = w.shape
    assert Cin_w == Cin and K == K2
    s, p = stride, padding
    assert 0 <= p <= K - 1

    Ho = (H - 1) * s - 2 * p + K
    Wo = (W - 1) * s - 2 * p + K
    # TODO(synk): the sub-pixel path assumes stride divides Ho/Wo (true for the
    # generator's K = stride + 2*padding); other configs need a dilated fallback.
    assert Ho % s == 0 and Wo % s == 0
    Qh, Qw = Ho // s, Wo // s

    # Window geometry: padded-input rows [qh, qh+WIN) feed coarse output row qh.
    lower = -((K - 1 - p) // s)
    upper = (s - 1 + p) // s
    WIN = upper - lower + 1
    pad_lo = -lower
    pad_hi_h = Qh + upper - H
    pad_hi_w = Qw + upper - W
    assert pad_lo >= 0 and pad_hi_h >= 0 and pad_hi_w >= 0

    # bf16 straight away: halves the XLA patch materialization and the kernel
    # P-operand read (the dominant HBM traffic). MXU still accumulates in f32.
    x_nhwc = jnp.transpose(x_nchw, (0, 2, 3, 1)).astype(matmul_dtype)
    xpad = jnp.pad(x_nhwc, ((0, 0), (pad_lo, pad_hi_h), (pad_lo, pad_hi_w), (0, 0)))

    # Compact sub-pixel patches: (N*Qh*Qw, WIN*WIN*Cin) -- no dilation zeros.
    # TODO(synk): build these WIN*WIN shifted windows inside kernel 1 from an
    # overlapping xpad tile (manual DMA) to avoid materializing `patches` in HBM.
    cols = []
    for dh in range(WIN):
        for dw in range(WIN):
            cols.append(xpad[:, dh:dh + Qh, dw:dw + Qw, :])
    KKC = WIN * WIN * Cin          # 36 for (K=4, s=2, Cin=4)
    CW = s * s * Cout              # 32
    R = N * Qh * Qw
    patches = jnp.stack(cols, axis=3).reshape(R, KKC)

    # Sub-pixel weight: W_sub[(dh,dw,ci),(rh,rw,co)] = w[ci,co,kh,kw],
    #   kh = rh + p - s*(lower + dh)  (zero column if out of [0,K)); kw analogous.
    w_f32 = w.astype(jnp.float32)
    W_full = jnp.zeros((WIN, WIN, Cin, s, s, Cout), jnp.float32)
    for dh in range(WIN):
        for rh in range(s):
            kh = rh + p - s * (lower + dh)
            if not 0 <= kh < K:
                continue
            for dw in range(WIN):
                for rw in range(s):
                    kw = rw + p - s * (lower + dw)
                    if not 0 <= kw < K:
                        continue
                    W_full = W_full.at[dh, dw, :, rh, rw, :].set(w_f32[:, :, kh, kw])
    W_sub = W_full.reshape(KKC, CW)

    # Pack G coarse pixels per matmul row -> lane width exactly 128.
    # (Do NOT grow G/L beyond 128: the block-diagonal already wastes G x MXU FLOPs,
    # which is free only while mem-bound.)
    G = 128 // CW if (CW <= 128 and 128 % CW == 0) else 1
    L = G * CW                     # 128
    Kg = G * KKC                   # 144
    Wbd = jnp.kron(jnp.eye(G, dtype=jnp.float32), W_sub).astype(matmul_dtype)

    gamma_f = gamma.astype(jnp.float32)
    beta_f = beta.astype(jnp.float32)
    cnt = float(N * Ho * Wo)
    Rg0 = -(-R // G)
    in_bytes = jnp.dtype(matmul_dtype).itemsize
    y_bytes = jnp.dtype(y_dtype).itemsize

    # --------------------------- fast fused path ------------------------------
    fused_vmem = (Rg0 * (_lane_pad(Kg) * in_bytes + 2 * _lane_pad(L) * 4)
                  + _lane_pad(L) * (Kg * in_bytes + L * 4 + 16))
    use_fused = (not force_tiled) and (Rg0 <= 2048) and (fused_vmem <= (6 << 20))

    if use_fused:
        Rg = _round_up(Rg0, 16)
        R_pad = Rg * G
        if R_pad != R:   # zero rows: contribute nothing to BN sums, sliced off below
            patches = jnp.concatenate(
                [patches, jnp.zeros((R_pad - R, KKC), patches.dtype)], axis=0)
        Pg = patches.reshape(Rg, Kg)

        gamma_lane = jnp.tile(gamma_f, L // Cout).reshape(1, L)
        beta_lane = jnp.tile(beta_f, L // Cout).reshape(1, L)
        lane_ch = jnp.arange(L, dtype=jnp.int32) % Cout
        same_ch = (lane_ch[:, None] == lane_ch[None, :]).astype(jnp.float32)

        kernel = functools.partial(_fused_convt_bn_relu_kernel,
                                   inv_cnt=1.0 / cnt, eps=float(eps))
        out_g = pl.pallas_call(
            kernel,
            out_shape=jax.ShapeDtypeStruct((Rg, L), jnp.float32),
            grid=(1,),
            in_specs=[pl.BlockSpec((Rg, Kg), lambda i: (0, 0)),
                      pl.BlockSpec((Kg, L), lambda i: (0, 0)),
                      pl.BlockSpec((1, L), lambda i: (0, 0)),
                      pl.BlockSpec((1, L), lambda i: (0, 0)),
                      pl.BlockSpec((L, L), lambda i: (0, 0))],
            out_specs=pl.BlockSpec((Rg, L), lambda i: (0, 0)),
            compiler_params=pltpu.CompilerParams(
                dimension_semantics=("arbitrary",),
                vmem_limit_bytes=int(min(max(4 * fused_vmem, 16 << 20), 32 << 20))),
        )(Pg, Wbd, gamma_lane, beta_lane, same_ch)
    else:
        # ------------------------- tiled path ---------------------------------
        # Corrected VMEM model: lane-padded Kg (144 -> 256), y out tile, Wbd and
        # x2 double-buffering all counted; budget kept under the 16 MiB default
        # scoped VMEM of v5e and an explicit vmem_limit_bytes is passed anyway.
        per_row = 2 * (_lane_pad(Kg) * in_bytes + _lane_pad(L) * y_bytes)
        fixed = 2 * (_lane_pad(L) * Kg * in_bytes) + 2 * (2 * _lane_pad(L) * 4)
        budget = 10 << 20
        cap_rows = max(16, ((budget - fixed) // per_row) // 16 * 16)
        trg_cap = min(_round_up(max(tile_rows, 16), 16), cap_rows)
        num_tiles = max(1, -(-Rg0 // trg_cap))
        if Rg0 >= 32:
            num_tiles = max(num_tiles, 2)   # >=2 grid steps: v7x megacore split
        TRg = _round_up(-(-Rg0 // num_tiles), 16)
        Rg = _round_up(Rg0, TRg)
        R_pad = Rg * G
        if R_pad != R:
            patches = jnp.concatenate(
                [patches, jnp.zeros((R_pad - R, KKC), patches.dtype)], axis=0)
        Pg = patches.reshape(Rg, Kg)
        T = Rg // TRg
        vmem_limit = int(min(max(2 * (TRg * per_row + fixed), 16 << 20), 32 << 20))

        y_g, stats = pl.pallas_call(
            _convt_matmul_stats_kernel,
            out_shape=(jax.ShapeDtypeStruct((Rg, L), y_dtype),
                       jax.ShapeDtypeStruct((T, 2, L), jnp.float32)),
            grid=(T,),
            in_specs=[pl.BlockSpec((TRg, Kg), lambda i: (i, 0)),
                      pl.BlockSpec((Kg, L), lambda i: (0, 0))],
            out_specs=(pl.BlockSpec((TRg, L), lambda i: (i, 0)),
                       pl.BlockSpec((1, 2, L), lambda i: (i, 0, 0))),
            compiler_params=pltpu.CompilerParams(
                dimension_semantics=("parallel",),
                vmem_limit_bytes=vmem_limit),
        )(Pg, Wbd)

        # Tiny stats finalize + folded affine; the affine + ReLU fuses with the
        # XLA pixel-shuffle epilogue below (no separate BN/ReLU HBM pass).
        lane_sum = jnp.sum(stats[:, 0, :], axis=0)   # (L,), lane l -> chan l % Cout
        lane_sq = jnp.sum(stats[:, 1, :], axis=0)
        ch_sum = lane_sum.reshape(L // Cout, Cout).sum(axis=0)
        ch_sq = lane_sq.reshape(L // Cout, Cout).sum(axis=0)
        mean = ch_sum / cnt
        var = jnp.maximum(ch_sq / cnt - mean * mean, 0.0)  # biased (training BN)
        inv = gamma_f * jax.lax.rsqrt(var + eps)
        shift = beta_f - mean * inv
        scale_lane = jnp.tile(inv, L // Cout).reshape(1, L)
        shift_lane = jnp.tile(shift, L // Cout).reshape(1, L)
        out_g = jnp.maximum(y_g.astype(jnp.float32) * scale_lane + shift_lane, 0.0)

    # ---- Un-pack: (Rg, G*CW) -> (R, s*s*Cout) -> pixel shuffle -> NCHW ---------
    y_rows = out_g.reshape(R_pad, CW)[:R]
    out_nhwc = y_rows.reshape(N, Qh, Qw, s, s, Cout)
    out_nhwc = jnp.transpose(out_nhwc, (0, 1, 3, 2, 4, 5)).reshape(N, Ho, Wo, Cout)
    return jnp.transpose(out_nhwc, (0, 3, 1, 2))


# ---------------------------------------------------------------------------
# Pure-JAX reference (dilated-input conv == PyTorch ConvTranspose2d) for the
# numerical self-check.
# ---------------------------------------------------------------------------
def _reference_forward(x, w, gamma, beta, stride, padding, eps=1e-5):
    K = w.shape[2]
    w_conv = jnp.transpose(jnp.flip(w, (2, 3)), (1, 0, 2, 3))   # (Cout,Cin,K,K)
    pad = K - 1 - padding
    y = jax.lax.conv_general_dilated(
        x.astype(jnp.float32), w_conv.astype(jnp.float32),
        window_strides=(1, 1), padding=[(pad, pad), (pad, pad)],
        lhs_dilation=(stride, stride), rhs_dilation=(1, 1),
        dimension_numbers=("NCHW", "OIHW", "NCHW"),
        precision=jax.lax.Precision.HIGHEST)
    mean = y.mean(axis=(0, 2, 3), keepdims=True)
    var = ((y - mean) ** 2).mean(axis=(0, 2, 3), keepdims=True)
    out = (y - mean) * jax.lax.rsqrt(var + eps)
    out = out * gamma.reshape(1, -1, 1, 1) + beta.reshape(1, -1, 1, 1)
    return jnp.maximum(out, 0.0)


if __name__ == "__main__":
    # Module config: Upsample(in_channels=4, out_channels=8, kernel_size=4,
    #                         stride=2, padding=1, batch_norm=True)
    in_channels, out_channels, kernel_size, stride, padding = 4, 8, 4, 2, 1

    key = jax.random.PRNGKey(0)
    kx, kw, kg, kb = jax.random.split(key, 4)

    x = jax.random.normal(kx, (2, in_channels, 16, 16), dtype=jnp.float32)
    w = jax.random.normal(
        kw, (in_channels, out_channels, kernel_size, kernel_size),
        dtype=jnp.float32) * 0.1
    gamma = jax.random.uniform(kg, (out_channels,), jnp.float32, 0.5, 1.5)
    beta = jax.random.normal(kb, (out_channels,), dtype=jnp.float32) * 0.1

    ref = jax.block_until_ready(
        _reference_forward(x, w, gamma, beta, stride, padding))

    # Default path for this size: single fused kernel, bf16 operands, f32 accum.
    out = jax.block_until_ready(
        upsample_forward(x, w, gamma, beta, stride=stride, padding=padding))
    assert out.shape == (2, out_channels, 32, 32), out.shape
    assert out.dtype == jnp.float32
    err_fused = float(jnp.max(jnp.abs(out - ref)))
    assert err_fused < 1e-1, f"fused bf16 path: max |pallas - ref| = {err_fused}"

    # Tiled path (used for large N*H*W), exercised here with small tiles + f32.
    out_tiled = jax.block_until_ready(
        upsample_forward(x, w, gamma, beta, stride=stride, padding=padding,
                         matmul_dtype=jnp.float32, y_dtype=jnp.float32,
                         tile_rows=32, force_tiled=True))
    assert out_tiled.shape == (2, out_channels, 32, 32)
    err_tiled = float(jnp.max(jnp.abs(out_tiled - ref)))
    assert err_tiled < 5e-2, f"tiled f32 path: max |pallas - ref| = {err_tiled}"

    print("KERNEL_OK")
</pallas_src>

<mosaic_0001>
module attributes {stable_mosaic.version = 11 : i64} {
  func.func @_fused_convt_bn_relu_kernel(%arg0: i32, %arg1: memref<128x144xbf16, #tpu.memory_space<vmem>>, %arg2: memref<144x128xbf16, #tpu.memory_space<vmem>>, %arg3: memref<1x128xf32, #tpu.memory_space<vmem>>, %arg4: memref<1x128xf32, #tpu.memory_space<vmem>>, %arg5: memref<128x128xf32, #tpu.memory_space<vmem>>, %arg6: memref<128x128xf32, #tpu.memory_space<vmem>>) attributes {dimension_semantics = [#tpu.dimension_semantics<arbitrary>], iteration_bounds = array<i64: 1>, scalar_prefetch = 0 : i64, scratch_operands = 0 : i64, tpu.core_type = #tpu.core_type<tc>, window_params = [{pipeline_mode = #tpu.pipeline_mode<synchronous>, transform_indices = @transform_0, window_bounds = array<i64: 128, 144>}, {pipeline_mode = #tpu.pipeline_mode<synchronous>, transform_indices = @transform_1, window_bounds = array<i64: 144, 128>}, {pipeline_mode = #tpu.pipeline_mode<synchronous>, transform_indices = @transform_2, window_bounds = array<i64: 1, 128>}, {pipeline_mode = #tpu.pipeline_mode<synchronous>, transform_indices = @transform_3, window_bounds = array<i64: 1, 128>}, {pipeline_mode = #tpu.pipeline_mode<synchronous>, transform_indices = @transform_4, window_bounds = array<i64: 128, 128>}, {pipeline_mode = #tpu.pipeline_mode<synchronous>, transform_indices = @transform_5, window_bounds = array<i64: 128, 128>}]} {
    %c0 = arith.constant 0 : index
    %c0_0 = arith.constant 0 : index
    %0 = vector.load %arg1[%c0, %c0_0] : memref<128x144xbf16, #tpu.memory_space<vmem>>, vector<128x144xbf16>
    %c0_1 = arith.constant 0 : index
    %c0_2 = arith.constant 0 : index
    %1 = vector.load %arg2[%c0_1, %c0_2] : memref<144x128xbf16, #tpu.memory_space<vmem>>, vector<144x128xbf16>
    %cst = arith.constant dense<0.000000e+00> : vector<128x128xf32>
    %2 = tpu.matmul %0, %1, %cst {dimension_numbers = #tpu.dot_dimension_numbers<[1], [0], [0], [1], [0, 0, 1, 1], [], []>} : vector<128x144xbf16>, vector<144x128xbf16>, vector<128x128xf32> -> vector<128x128xf32>
    %cst_3 = arith.constant dense<0.000000e+00> : vector<128xf32>
    %3 = vector.multi_reduction <add>, %2, %cst_3 [0] : vector<128x128xf32> to vector<128xf32>
    %4 = vector.shape_cast %3 : vector<128xf32> to vector<1x128xf32>
    %5 = arith.mulf %2, %2 : vector<128x128xf32>
    %cst_4 = arith.constant dense<0.000000e+00> : vector<128xf32>
    %6 = vector.multi_reduction <add>, %5, %cst_4 [0] : vector<128x128xf32> to vector<128xf32>
    %7 = vector.shape_cast %6 : vector<128xf32> to vector<1x128xf32>
    %c0_5 = arith.constant 0 : index
    %c0_6 = arith.constant 0 : index
    %8 = vector.load %arg5[%c0_5, %c0_6] : memref<128x128xf32, #tpu.memory_space<vmem>>, vector<128x128xf32>
    %cst_7 = arith.constant dense<0.000000e+00> : vector<1x128xf32>
    %9 = tpu.matmul %4, %8, %cst_7 {dimension_numbers = #tpu.dot_dimension_numbers<[1], [0], [0], [1], [0, 0, 1, 1], [], []>} : vector<1x128xf32>, vector<128x128xf32>, vector<1x128xf32> -> vector<1x128xf32>
    %c0_8 = arith.constant 0 : index
    %c0_9 = arith.constant 0 : index
    %10 = vector.load %arg5[%c0_8, %c0_9] : memref<128x128xf32, #tpu.memory_space<vmem>>, vector<128x128xf32>
    %cst_10 = arith.constant dense<0.000000e+00> : vector<1x128xf32>
    %11 = tpu.matmul %7, %10, %cst_10 {dimension_numbers = #tpu.dot_dimension_numbers<[1], [0], [0], [1], [0, 0, 1, 1], [], []>} : vector<1x128xf32>, vector<128x128xf32>, vector<1x128xf32> -> vector<1x128xf32>
    %cst_11 = arith.constant 4.8828125E-4 : f32
    %12 = vector.broadcast %cst_11 : f32 to vector<1x128xf32>
    %13 = arith.mulf %9, %12 : vector<1x128xf32>
    %cst_12 = arith.constant 4.8828125E-4 : f32
    %14 = vector.broadcast %cst_12 : f32 to vector<1x128xf32>
    %15 = arith.mulf %11, %14 : vector<1x128xf32>
    %16 = arith.mulf %13, %13 : vector<1x128xf32>
    %17 = arith.subf %15, %16 : vector<1x128xf32>
    %cst_13 = arith.constant 0.000000e+00 : f32
    %18 = vector.broadcast %cst_13 : f32 to vector<1x128xf32>
    %19 = arith.maximumf %17, %18 : vector<1x128xf32>
    %c0_14 = arith.constant 0 : index
    %c0_15 = arith.constant 0 : index
    %20 = vector.load %arg3[%c0_14, %c0_15] : memref<1x128xf32, #tpu.memory_space<vmem>>, vector<1x128xf32>
    %cst_16 = arith.constant 9.99999974E-6 : f32
    %21 = vector.broadcast %cst_16 : f32 to vector<1x128xf32>
    %22 = arith.addf %19, %21 : vector<1x128xf32>
    %23 = math.rsqrt %22 : vector<1x128xf32>
    %24 = arith.mulf %20, %23 : vector<1x128xf32>
    %c0_17 = arith.constant 0 : index
    %c0_18 = arith.constant 0 : index
    %25 = vector.load %arg4[%c0_17, %c0_18] : memref<1x128xf32, #tpu.memory_space<vmem>>, vector<1x128xf32>
    %26 = arith.mulf %13, %24 : vector<1x128xf32>
    %27 = arith.subf %25, %26 : vector<1x128xf32>
    %28 = vector.broadcast %24 : vector<1x128xf32> to vector<128x128xf32>
    %29 = arith.mulf %2, %28 : vector<128x128xf32>
    %30 = vector.broadcast %27 : vector<1x128xf32> to vector<128x128xf32>
    %31 = arith.addf %29, %30 : vector<128x128xf32>
    %cst_19 = arith.constant 0.000000e+00 : f32
    %32 = vector.broadcast %cst_19 : f32 to vector<128x128xf32>
    %33 = arith.maximumf %31, %32 : vector<128x128xf32>
    %c0_20 = arith.constant 0 : index
    %c0_21 = arith.constant 0 : index
    %34 = vector.load %arg6[%c0_20, %c0_21] : memref<128x128xf32, #tpu.memory_space<vmem>>, vector<128x128xf32>
    tpu.vector_store %arg6[%c0_20, %c0_21], %33 {strides = array<i32>} : memref<128x128xf32, #tpu.memory_space<vmem>>, vector<128x128xf32>,
    return
  }
  func.func @transform_0(%arg0: i32) -> (i32, i32) {
    %c0_i32 = arith.constant 0 : i32
    %c0_i32_0 = arith.constant 0 : i32
    %c0_i32_1 = arith.constant 0 : i32
    return %c0_i32, %c0_i32_0 : i32, i32
  }
  func.func @transform_1(%arg0: i32) -> (i32, i32) {
    %c0_i32 = arith.constant 0 : i32
    %c0_i32_0 = arith.constant 0 : i32
    %c0_i32_1 = arith.constant 0 : i32
    return %c0_i32, %c0_i32_0 : i32, i32
  }
  func.func @transform_2(%arg0: i32) -> (i32, i32) {
    %c0_i32 = arith.constant 0 : i32
    %c0_i32_0 = arith.constant 0 : i32
    %c0_i32_1 = arith.constant 0 : i32
    return %c0_i32, %c0_i32_0 : i32, i32
  }
  func.func @transform_3(%arg0: i32) -> (i32, i32) {
    %c0_i32 = arith.constant 0 : i32
    %c0_i32_0 = arith.constant 0 : i32
    %c0_i32_1 = arith.constant 0 : i32
    return %c0_i32, %c0_i32_0 : i32, i32
  }
  func.func @transform_4(%arg0: i32) -> (i32, i32) {
    %c0_i32 = arith.constant 0 : i32
    %c0_i32_0 = arith.constant 0 : i32
    %c0_i32_1 = arith.constant 0 : i32
    return %c0_i32, %c0_i32_0 : i32, i32
  }
  func.func @transform_5(%arg0: i32) -> (i32, i32) {
    %c0_i32 = arith.constant 0 : i32
    %c0_i32_0 = arith.constant 0 : i32
    %c0_i32_1 = arith.constant 0 : i32
    return %c0_i32, %c0_i32_0 : i32, i32
  }
}

</mosaic_0001>

<bundles_post_ra>
// kernel: tpu_custom_call.1
= control target key start
LH: loop header
LB: loop body
LE: loop exit
PB: predicated region body
PF: predicated region fallthrough
CT: control target
= control target key end

     0   :  { %v873_v1 = vmov 0   ;;  %vm182_vm0 = vcmask 130048   ;;  %s1214_s0 = inlined_call_operand.vmem [shape: bf16[128,144], index: 0, kind: input, shape index: {}]   ;;  %s1215_s1 = inlined_call_operand.vmem [shape: bf16[144,128], index: 1, kind: input, shape index: {}]   ;;  %s1216_s2 = inlined_call_operand.vmem [shape: f32[1,128], index: 2, kind: input, shape index: {}]   ;;  %s1217_s3 = inlined_call_operand.vmem [shape: f32[1,128], index: 3, kind: input, shape index: {}]   ;;  %s1218_s4 = inlined_call_operand.vmem [shape: f32[128,128], index: 4, kind: input, shape index: {}]   ;;  %s1219_s5 = inlined_call_operand.hbm [shape: f32[128,128], index: 5, kind: output, shape index: {}]  }
   0x1   :  { %v814_v0 = vld [vmem:[%s1215_s1] sm:$0xff]   ;;  %207 = vmatprep.subr.bf16.mxu0 %v873_v1  ;;  %v815_v2 = vld [vmem:[%s1215_s1 + $0x8] sm:$0xff]   ;;  %v816_v3 = vld [vmem:[%s1215_s1 + $0x10] sm:$0xff]  }
   0x2   :  { %208 = vmatpush1.bf16.msra.mxu0 %v814_v0  ;;  %v817_v4 = vld [vmem:[%s1215_s1 + $0x18] sm:$0xff]   ;;  %v825_v5 = vld [vmem:[%s1214_s0 + $0x4] ss:$8 sps:$4 sm:$0xff]  }
   0x3   :  { %209 = vmatprep.subr.bf16.mxu0 %v873_v1  ;;  %647 = vmatprep.mubr.msk.bf16.mxu0 %vm182_vm0, %v825_v5  ;;  %v818_v6 = vld [vmem:[%s1215_s1 + $0x20] sm:$0xff]   ;;  %v819_v7 = vld [vmem:[%s1215_s1 + $0x28] sm:$0xff]  }
   0x6   :  { %210 = vmatpush1.bf16.msra.mxu0 %v815_v2 }
   0x7   :  { %211 = vmatprep.subr.bf16.mxu0 %v873_v1 }
   0xa   :  { %212 = vmatpush1.bf16.msra.mxu0 %v816_v3 }
   0xb   :  { %213 = vmatprep.subr.bf16.mxu0 %v873_v1 }
   0xe   :  { %214 = vmatpush1.bf16.msra.mxu0 %v817_v4 }
   0xf   :  { %215 = vmatprep.subr.bf16.mxu0 %v873_v1 }
  0x12   :  { %216 = vmatpush1.bf16.msra.mxu0 %v818_v6 }
  0x13   :  { %217 = vmatprep.subr.bf16.mxu0 %v873_v1 }
  0x14   :  { %10 = vsyncpa [#allocation3], 0  ;;  %v820_v8 = vld [vmem:[%s1215_s1 + $0x30] sm:$0xff]   ;;  %v821_v9 = vld [vmem:[%s1215_s1 + $0x38] sm:$0xff]   ;;  %v874_v29 = vmov 0.0|0.0   ;;  %vm875_vm1 = vmmov 0  }
  0x15   :  { %v822_v10 = vld [vmem:[%s1215_s1 + $0x40] sm:$0xff]   ;;  %v826_v12 = vld [vmem:[%s1214_s0 + $0x14] ss:$8 sps:$4 sm:$0xff]   ;;  %v828_v13 = vld [vmem:[%s1214_s0 + $0x10] ss:$8 sps:$4 sm:$0xff]   ;;  %759 = vmatprep.subr.bf16.mxu1 %v874_v29  ;;  %v876_v51 = vmov 0.0  }
  0x16   :  { %218 = vmatpush1.bf16.msra.mxu0 %v819_v7  ;;  %v823_v11 = vld [vmem:[%s1214_s0] ss:$8 sps:$4 sm:$0xff]   ;;  %v829_v14 = vld [vmem:[%s1214_s0 + $0x24] ss:$8 sps:$4 sm:$0xff]   ;;  %v832_v16 = vld [vmem:[%s1214_s0 + $0x34] ss:$8 sps:$4 sm:$0xff]   ;;  %721 = vmatprep.mubr.msk.f32.mxu1 %vm875_vm1, %v876_v51 }
  0x17   :  { %219 = vmatprep.subr.bf16.mxu0 %v873_v1  ;;  %v831_v15 = vld [vmem:[%s1214_s0 + $0x20] ss:$8 sps:$4 sm:$0xff]   ;;  %v834_v17 = vld [vmem:[%s1214_s0 + $0x30] ss:$8 sps:$4 sm:$0xff]   ;;  %v835_v18 = vld [vmem:[%s1214_s0 + $0x44] ss:$8 sps:$4 sm:$0xff]  }
  0x18   :  { %v837_v19 = vld [vmem:[%s1214_s0 + $0x40] ss:$8 sps:$4 sm:$0xff]   ;;  %v838_v20 = vld [vmem:[%s1214_s0 + $0x54] ss:$8 sps:$4 sm:$0xff]   ;;  %v840_v21 = vld [vmem:[%s1214_s0 + $0x50] ss:$8 sps:$4 sm:$0xff]  }
  0x19   :  { %v841_v22 = vld [vmem:[%s1214_s0 + $0x64] ss:$8 sps:$4 sm:$0xff]   ;;  %v843_v23 = vld [vmem:[%s1214_s0 + $0x60] ss:$8 sps:$4 sm:$0xff]   ;;  %v844_v24 = vld [vmem:[%s1214_s0 + $0x74] ss:$8 sps:$4 sm:$0xff]  }
  0x1a   :  { %220 = vmatpush1.bf16.msra.mxu0 %v820_v8  ;;  %v846_v25 = vld [vmem:[%s1214_s0 + $0x70] ss:$8 sps:$4 sm:$0xff]   ;;  %v362_v26 = vld [vmem:[%s1218_s4] sm:$0xff]  ;;  %v363_v27 = vld [vmem:[%s1218_s4 + $0x8] sm:$0xff] }
  0x1b   :  { %221 = vmatprep.subr.bf16.mxu0 %v873_v1  ;;  %v999_v28 = vpack.c.bf16 %v363_v27, %v362_v26  ;;  %v364_v30 = vld [vmem:[%s1218_s4 + $0x10] sm:$0xff]  ;;  %v365_v31 = vld [vmem:[%s1218_s4 + $0x18] sm:$0xff]  ;;  %v366_v33 = vld [vmem:[%s1218_s4 + $0x20] sm:$0xff] }
  0x1c   :  { %v1010_v32 = vpack.c.bf16 %v365_v31, %v364_v30  ;;  %v367_v34 = vld [vmem:[%s1218_s4 + $0x28] sm:$0xff]  ;;  %v368_v36 = vld [vmem:[%s1218_s4 + $0x30] sm:$0xff]  ;;  %v369_v37 = vld [vmem:[%s1218_s4 + $0x38] sm:$0xff] }
  0x1d   :  { %761 = vmatpush3.bf16.msra.mxu1 %v999_v28  ;;  %v1020_v35 = vpack.c.bf16 %v367_v34, %v366_v33  ;;  %v1030_v38 = vpack.c.bf16 %v369_v37, %v368_v36  ;;  %v370_v39 = vld [vmem:[%s1218_s4 + $0x40] sm:$0xff]  ;;  %v371_v40 = vld [vmem:[%s1218_s4 + $0x48] sm:$0xff]  ;;  %v372_v42 = vld [vmem:[%s1218_s4 + $0x50] sm:$0xff] }
  0x1e   :  { %222 = vmatpush1.bf16.msra.mxu0 %v821_v9  ;;  %762 = vmatprep.subr.bf16.mxu1 %v874_v29  ;;  %v1040_v41 = vpack.c.bf16 %v371_v40, %v370_v39  ;;  %v373_v43 = vld [vmem:[%s1218_s4 + $0x58] sm:$0xff]  ;;  %v374_v45 = vld [vmem:[%s1218_s4 + $0x60] sm:$0xff]  ;;  %v375_v46 = vld [vmem:[%s1218_s4 + $0x68] sm:$0xff] }
  0x1f   :  { %223 = vmatprep.subr.bf16.mxu0 %v873_v1  ;;  %v1050_v44 = vpack.c.bf16 %v373_v43, %v372_v42  ;;  %v1060_v47 = vpack.c.bf16 %v375_v46, %v374_v45  ;;  %v376_v48 = vld [vmem:[%s1218_s4 + $0x70] sm:$0xff]  ;;  %v377_v49 = vld [vmem:[%s1218_s4 + $0x78] sm:$0xff] }
  0x20   :  { %v1070_v50 = vpack.c.bf16 %v377_v49, %v376_v48 }
  0x21   :  { %764 = vmatpush3.bf16.msra.mxu1 %v1010_v32 }
  0x22   :  { %224 = vmatpush1.bf16.msra.mxu0 %v822_v10  ;;  %765 = vmatprep.subr.bf16.mxu1 %v874_v29 }
  0x25   :  { %240 = vmatmul.mubr.bf16.vlgmr.msra.gmra.mrb[0].mxu0 %v823_v11  ;;  %767 = vmatpush3.bf16.msra.mxu1 %v1020_v35 }
  0x26   :  { %648 = vmatprep.mubr.msk.bf16.mxu0 %vm182_vm0, %v826_v12  ;;  %768 = vmatprep.subr.bf16.mxu1 %v874_v29 }
  0x29   :  { %770 = vmatpush3.bf16.msra.mxu1 %v1030_v38 }
  0x2a   :  { %771 = vmatprep.subr.bf16.mxu1 %v874_v29 }
  0x2d   :  { %248 = vmatmul.mubr.bf16.gmra.mrb[4].mxu0 %v828_v13  ;;  %773 = vmatpush3.bf16.msra.mxu1 %v1040_v41 }
  0x2e   :  { %649 = vmatprep.mubr.msk.bf16.mxu0 %vm182_vm0, %v829_v14  ;;  %774 = vmatprep.subr.bf16.mxu1 %v874_v29 }
  0x31   :  { %776 = vmatpush3.bf16.msra.mxu1 %v1050_v44 }
  0x32   :  { %777 = vmatprep.subr.bf16.mxu1 %v874_v29 }
  0x35   :  { %256 = vmatmul.mubr.bf16.gmra.mrb[8].mxu0 %v831_v15  ;;  %779 = vmatpush3.bf16.msra.mxu1 %v1060_v47 }
  0x36   :  { %650 = vmatprep.mubr.msk.bf16.mxu0 %vm182_vm0, %v832_v16  ;;  %780 = vmatprep.subr.bf16.mxu1 %v874_v29 }
  0x39   :  { %782 = vmatpush3.bf16.msra.mxu1 %v1070_v50 }
  0x3a   :  { %783 = vmatprep.subr.bf16.mxu1 %v874_v29 }
  0x3d   :  { %264 = vmatmul.mubr.bf16.gmra.mrb[12].mxu0 %v834_v17 }
  0x3e   :  { %651 = vmatprep.mubr.msk.bf16.mxu0 %vm182_vm0, %v835_v18 }
  0x45   :  { %272 = vmatmul.mubr.bf16.gmra.mrb[16].mxu0 %v837_v19 }
  0x46   :  { %652 = vmatprep.mubr.msk.bf16.mxu0 %vm182_vm0, %v838_v20 }
  0x4d   :  { %280 = vmatmul.mubr.bf16.gmra.mrb[20].mxu0 %v840_v21 }
  0x4e   :  { %653 = vmatprep.mubr.msk.bf16.mxu0 %vm182_vm0, %v841_v22 }
  0x55   :  { %288 = vmatmul.mubr.bf16.gmra.mrb[24].mxu0 %v843_v23 }
  0x56   :  { %654 = vmatprep.mubr.msk.bf16.mxu0 %vm182_vm0, %v844_v24 }
  0x5d   :  { %296 = vmatmul.mubr.bf16.gmra.mrb[28].mxu0 %v846_v25 }
  0xf8   :  { %v1076_v52 = vpop.f32.mrb[0].mxu0 }
  0xf9   :  { %v243_v53 = vpop.f32.mrb[1].mxu0  ;;  %v325_v55 = vmul.f32 %v1076_v52, %v1076_v52 }
  0xfa   :  { %v1078_v54 = vpop.f32.mrb[2].mxu0 }
  0xfb   :  { %v304_v56 = vadd.f32 %v1078_v54, %v1076_v52  ;;  %v326_v57 = vmul.f32 %v1078_v54, %v1078_v54  ;;  %v246_v58 = vpop.f32.mrb[3].mxu0 }
  0xfd   :  { %v341_v59 = vadd.f32 %v326_v57, %v325_v55 }
 0x100   :  { %v1086_v60 = vpop.f32.mrb[4].mxu0 }
 0x101   :  { %v305_v61 = vadd.f32 %v304_v56, %v1086_v60  ;;  %v327_v62 = vmul.f32 %v1086_v60, %v1086_v60  ;;  %v251_v63 = vpop.f32.mrb[5].mxu0 }
 0x102   :  { %v1091_v0 = vpop.f32.mrb[6].mxu0 }
 0x103   :  { %v342_v1 = vadd.f32 %v341_v59, %v327_v62  ;;  %v306_v2 = vadd.f32 %v305_v61, %v1091_v0  ;;  %v328_v3 = vmul.f32 %v1091_v0, %v1091_v0  ;;  %v254_v4 = vpop.f32.mrb[7].mxu0 }
 0x105   :  { %v343_v5 = vadd.f32 %v342_v1, %v328_v3 }
 0x108   :  { %v1096_v6 = vpop.f32.mrb[8].mxu0 }
 0x109   :  { %v307_v7 = vadd.f32 %v306_v2, %v1096_v6  ;;  %v329_v8 = vmul.f32 %v1096_v6, %v1096_v6  ;;  %v259_v9 = vpop.f32.mrb[9].mxu0 }
 0x10a   :  { %v1101_v10 = vpop.f32.mrb[10].mxu0 }
 0x10b   :  { %v344_v11 = vadd.f32 %v343_v5, %v329_v8  ;;  %v308_v12 = vadd.f32 %v307_v7, %v1101_v10  ;;  %v330_v13 = vmul.f32 %v1101_v10, %v1101_v10  ;;  %v262_v14 = vpop.f32.mrb[11].mxu0 }
 0x10d   :  { %v345_v15 = vadd.f32 %v344_v11, %v330_v13 }
 0x110   :  { %v1106_v16 = vpop.f32.mrb[12].mxu0 }
 0x111   :  { %v309_v17 = vadd.f32 %v308_v12, %v1106_v16  ;;  %v331_v18 = vmul.f32 %v1106_v16, %v1106_v16  ;;  %v267_v19 = vpop.f32.mrb[13].mxu0 }
 0x112   :  { %v1111_v20 = vpop.f32.mrb[14].mxu0 }
 0x113   :  { %v346_v21 = vadd.f32 %v345_v15, %v331_v18  ;;  %v310_v22 = vadd.f32 %v309_v17, %v1111_v20  ;;  %v332_v23 = vmul.f32 %v1111_v20, %v1111_v20  ;;  %v270_v24 = vpop.f32.mrb[15].mxu0 }
 0x115   :  { %v347_v25 = vadd.f32 %v346_v21, %v332_v23 }
 0x118   :  { %v1116_v26 = vpop.f32.mrb[16].mxu0 }
 0x119   :  { %v311_v27 = vadd.f32 %v310_v22, %v1116_v26  ;;  %v333_v30 = vmul.f32 %v1116_v26, %v1116_v26  ;;  %v275_v31 = vpop.f32.mrb[17].mxu0 }
 0x11a   :  { %v1121_v33 = vpop.f32.mrb[18].mxu0 }
 0x11b   :  { %v348_v34 = vadd.f32 %v347_v25, %v333_v30  ;;  %v312_v36 = vadd.f32 %v311_v27, %v1121_v33  ;;  %v334_v37 = vmul.f32 %v1121_v33, %v1121_v33  ;;  %v278_v39 = vpop.f32.mrb[19].mxu0 }
 0x11d   :  { %v349_v40 = vadd.f32 %v348_v34, %v334_v37 }
 0x120   :  { %v1126_v42 = vpop.f32.mrb[20].mxu0 }
 0x121   :  { %v313_v43 = vadd.f32 %v312_v36, %v1126_v42  ;;  %v335_v45 = vmul.f32 %v1126_v42, %v1126_v42  ;;  %v283_v46 = vpop.f32.mrb[21].mxu0 }
 0x122   :  { %v1131_v48 = vpop.f32.mrb[22].mxu0 }
 0x123   :  { %v350_v49 = vadd.f32 %v349_v40, %v335_v45  ;;  %v314_v53 = vadd.f32 %v313_v43, %v1131_v48  ;;  %v336_v55 = vmul.f32 %v1131_v48, %v1131_v48  ;;  %v286_v56 = vpop.f32.mrb[23].mxu0  ;;  %v531_v45 = vlaneseq }
 0x125   :  { %v351_v57 = vadd.f32 %v350_v49, %v336_v55 }
 0x128   :  { %v1136_v58 = vpop.f32.mrb[24].mxu0 }
 0x129   :  { %v315_v59 = vadd.f32 %v314_v53, %v1136_v58  ;;  %v337_v61 = vmul.f32 %v1136_v58, %v1136_v58  ;;  %v291_v62 = vpop.f32.mrb[25].mxu0  ;;  %v527_v53 = vld [vmem:[%s1217_s3] sm:$0x1] }
 0x12a   :  { %v1141_v63 = vpop.f32.mrb[26].mxu0 }
 0x12b   :  { %v352_v1 = vadd.f32 %v351_v57, %v337_v61  ;;  %v316_v2 = vadd.f32 %v315_v59, %v1141_v63  ;;  %v338_v3 = vmul.f32 %v1141_v63, %v1141_v63  ;;  %v294_v4 = vpop.f32.mrb[27].mxu0 }
 0x12d   :  { %v353_v5 = vadd.f32 %v352_v1, %v338_v3 }
 0x130   :  { %v1146_v7 = vpop.f32.mrb[28].mxu0 }
 0x131   :  { %v317_v8 = vadd.f32 %v316_v2, %v1146_v7  ;;  %v339_v9 = vmul.f32 %v1146_v7, %v1146_v7  ;;  %v299_v11 = vpop.f32.mrb[29].mxu0 }
 0x132   :  { %v1151_v12 = vpop.f32.mrb[30].mxu0 }
 0x133   :  { %v354_v13 = vadd.f32 %v353_v5, %v339_v9  ;;  %v318_v14 = vadd.f32 %v317_v8, %v1151_v12  ;;  %v340_v15 = vmul.f32 %v1151_v12, %v1151_v12  ;;  %v302_v17 = vpop.f32.mrb[31].mxu0 }
 0x135   :  { %v319_v18 = vrot.slane %v318_v14, 4  ;;  %v355_v19 = vadd.f32 %v354_v13, %v340_v15 }
 0x137   :  { %v320_v21 = vadd.f32 %v319_v18, %v318_v14  ;;  %v356_v27 = vrot.slane %v355_v19, 4 }
 0x139   :  { %v321_v22 = vrot.slane %v320_v21, 2  ;;  %v357_v30 = vadd.f32 %v356_v27, %v355_v19 }
 0x13b   :  { %v322_v23 = vadd.f32 %v321_v22, %v320_v21 }
 0x13d   :  { %v323_v24 = vrot.slane %v322_v23, 1 }
 0x13f   :  { %v324_v25 = vadd.f32 %v323_v24, %v322_v23 }
 0x141   :  { %722 = vmatmul.mubr.f32.vlgmr.msra.gmra.mrb[0].mxu1 %v324_v25 }
 0x142   :  { %785 = vmatpush3.bf16.msra.mxu1 %v999_v28  ;;  %756 = vmatprep.mubr.msk.f32.mxu1 %vm875_vm1, %v876_v51  ;;  %v358_v28 = vrot.slane %v357_v30, 2 }
 0x143   :  { %786 = vmatprep.subr.bf16.mxu1 %v874_v29 }
 0x146   :  { %788 = vmatpush3.bf16.msra.mxu1 %v1010_v32  ;;  %v359_v32 = vadd.f32 %v358_v28, %v357_v30 }
 0x147   :  { %789 = vmatprep.subr.bf16.mxu1 %v874_v29 }
 0x14a   :  { %791 = vmatpush3.bf16.msra.mxu1 %v1020_v35  ;;  %v360_v35 = vrot.slane %v359_v32, 1 }
 0x14b   :  { %792 = vmatprep.subr.bf16.mxu1 %v874_v29 }
 0x14e   :  { %794 = vmatpush3.bf16.msra.mxu1 %v1030_v38  ;;  %v361_v38 = vadd.f32 %v360_v35, %v359_v32 }
 0x14f   :  { %795 = vmatprep.subr.bf16.mxu1 %v874_v29 }
 0x152   :  { %797 = vmatpush3.bf16.msra.mxu1 %v1040_v41 }
 0x153   :  { %798 = vmatprep.subr.bf16.mxu1 %v874_v29 }
 0x156   :  { %800 = vmatpush3.bf16.msra.mxu1 %v1050_v44 }
 0x157   :  { %801 = vmatprep.subr.bf16.mxu1 %v874_v29 }
 0x15a   :  { %803 = vmatpush3.bf16.msra.mxu1 %v1060_v47  ;;  %v532_v47 = vshrl.u32 %v531_v45, 7 }
 0x15b   :  { %804 = vmatprep.subr.bf16.mxu1 %v874_v29  ;;  %v523_v29 = vld [vmem:[%s1216_s2] sm:$0x1]  ;;  %s877_s2 = smov [#allocation2]  }
 0x15c   :  { %s611_s3 = sshll.u32 %s877_s2, 4  ;;  %s1195_s3 = int_to_ptr.vmem [resolvable:$true] %s611_s3 }
 0x15d   :  { %s849_s23 = scalar_lea.vmem %s1195_s3, 2048  ;;  %p854_p1 = scmp.lt.s32.totalorder %s1195_s3, %s1195_s3 }
 0x15e   :  { %806 = vmatpush3.bf16.msra.mxu1 %v1070_v50  ;;  %v533_v50 = vsub.s32 0, %v532_v47  ;;  %p850_p0 = scmp.ne.s32.totalorder %s1195_s3, %s849_s23  ;;  %p855_p2 = scmp.lt.s32.totalorder %s849_s23, %s849_s23 }
 0x160   :  { %p856_p3 = por %p855_p2, %p854_p1 }
 0x161   :  { %757 = vmatmul.mubr.f32.vlgmr.msra.gmra.mrb[2].mxu1 %v361_v38 }
 0x162   :  { %p857_p4 = pnand %p856_p3, %p850_p0 }
 0x214   :  { %v444_v51 = vpop.f32.mrb[0].mxu1 }
 0x215   :  { %v723_v31 = vpop.f32.mrb[1].mxu1  ;;  %v518_v41 = vmul.f32 0.00048828125, %v444_v51 }
 0x217   :  { %v520_v36 = vmul.f32 %v518_v41, %v518_v41 }
 0x234   :  { %v514_v34 = vpop.f32.mrb[2].mxu1 }
 0x235   :  { %v519_v37 = vmul.f32 0.00048828125, %v514_v34  ;;  %v758_v39 = vpop.f32.mrb[3].mxu1 }
 0x237   :  { %v521_v44 = vsub.f32 %v519_v37, %v520_v36 }
 0x239   :  { %v522_v40 = vmax.f32 %v521_v44, 0.0 }
 0x23b   :  { %v524_v43 = vadd.f32 1e-05, %v522_v40 }
 0x23d   :  { %847 = vrsqrt.f32 %v524_v43 }
 0x247   :  { %v848_v46 = vpop.eup %847 }
 0x248   :  { %v526_v49 = vmul.f32 %v848_v46, %v523_v29 }
 0x24a   :  { %v528_v55 = vmul.f32 %v526_v49, %v518_v41  ;;  %v534_v56 = vrot.slane %v526_v49, %v533_v50 }
 0x24c   :  { %v529_v57 = vsub.f32 %v527_v53, %v528_v55  ;;  %v536_v59 = vmul.f32 %v534_v56, %v1076_v52  ;;  %v537_v61 = vmul.f32 %v534_v56, %v1078_v54  ;;  %v538_v62 = vmul.f32 %v534_v56, %v1086_v60 }
 0x24d   :  { %v539_v1 = vmul.f32 %v534_v56, %v1091_v0  ;;  %v540_v2 = vmul.f32 %v534_v56, %v1096_v6  ;;  %v541_v3 = vmul.f32 %v534_v56, %v1101_v10  ;;  %v542_v4 = vmul.f32 %v534_v56, %v1106_v16 }
 0x24e   :  { %v556_v5 = vrot.slane %v529_v57, %v533_v50  ;;  %v543_v8 = vmul.f32 %v534_v56, %v1111_v20  ;;  %v544_v9 = vmul.f32 %v534_v56, %v1116_v26  ;;  %v545_v11 = vmul.f32 %v534_v56, %v1121_v33 }
 0x24f   :  { %v546_v52 = vmul.f32 %v534_v56, %v1126_v42  ;;  %v547_v54 = vmul.f32 %v534_v56, %v1131_v48  ;;  %v548_v60 = vmul.f32 %v534_v56, %v1136_v58  ;;  %v549_v0 = vmul.f32 %v534_v56, %v1141_v63 }
 0x250   :  { %v550_v6 = vmul.f32 %v534_v56, %v1146_v7  ;;  %v551_v10 = vmul.f32 %v534_v56, %v1151_v12  ;;  %v558_v16 = vadd.f32 %v556_v5, %v536_v59  ;;  %v559_v13 = vadd.f32 %v556_v5, %v537_v61 }
 0x251   :  { %v560_v14 = vadd.f32 %v556_v5, %v538_v62  ;;  %v561_v20 = vadd.f32 %v556_v5, %v539_v1  ;;  %v562_v15 = vadd.f32 %v556_v5, %v540_v2  ;;  %v563_v26 = vadd.f32 %v556_v5, %v541_v3 }
 0x252   :  { %v564_v17 = vadd.f32 %v556_v5, %v542_v4  ;;  %v565_v33 = vadd.f32 %v556_v5, %v543_v8  ;;  %v566_v18 = vadd.f32 %v556_v5, %v544_v9  ;;  %v567_v42 = vadd.f32 %v556_v5, %v545_v11 }
 0x253   :  { %v568_v19 = vadd.f32 %v556_v5, %v546_v52  ;;  %v569_v48 = vadd.f32 %v556_v5, %v547_v54  ;;  %v570_v21 = vadd.f32 %v556_v5, %v548_v60  ;;  %v571_v58 = vadd.f32 %v556_v5, %v549_v0 }
 0x254   :  { %v572_v22 = vadd.f32 %v556_v5, %v550_v6  ;;  %v573_v63 = vadd.f32 %v556_v5, %v551_v10  ;;  %v574_v23 = vmax.f32 %v558_v16, 0.0  ;;  %v575_v7 = vmax.f32 %v559_v13, 0.0 }
 0x255   :  { %v576_v12 = vmax.f32 %v560_v14, 0.0  ;;  %v577_v24 = vmax.f32 %v561_v20, 0.0  ;;  %v578_v25 = vmax.f32 %v562_v15, 0.0  ;;  %v579_v27 = vmax.f32 %v563_v26, 0.0 }
 0x256   :  { %v580_v30 = vmax.f32 %v564_v17, 0.0  ;;  %v581_v28 = vmax.f32 %v565_v33, 0.0  ;;  %v582_v32 = vmax.f32 %v566_v18, 0.0  ;;  %v583_v35 = vmax.f32 %v567_v42, 0.0  ;;  %590 = vst [vmem:[#allocation2] sm:$0xff] %v574_v23  ;;  %591 = vst [vmem:[#allocation2 + $0x8] sm:$0xff] %v575_v7 }
 0x257   :  { %v584_v38 = vmax.f32 %v568_v19, 0.0  ;;  %v585_v51 = vmax.f32 %v569_v48, 0.0  ;;  %v586_v31 = vmax.f32 %v570_v21, 0.0  ;;  %v587_v41 = vmax.f32 %v571_v58, 0.0  ;;  %592 = vst [vmem:[#allocation2 + $0x10] sm:$0xff] %v576_v12  ;;  %593 = vst [vmem:[#allocation2 + $0x18] sm:$0xff] %v577_v24 }
 0x258   :  { %594 = vst [vmem:[#allocation2 + $0x20] sm:$0xff] %v578_v25  ;;  %595 = vst [vmem:[#allocation2 + $0x28] sm:$0xff] %v579_v27  ;;  %v588_v34 = vmax.f32 %v572_v22, 0.0  ;;  %v589_v36 = vmax.f32 %v573_v63, 0.0 }
 0x259   :  { %596 = vst [vmem:[#allocation2 + $0x30] sm:$0xff] %v580_v30  ;;  %597 = vst [vmem:[#allocation2 + $0x38] sm:$0xff] %v581_v28 }
 0x25a   :  { %598 = vst [vmem:[#allocation2 + $0x40] sm:$0xff] %v582_v32  ;;  %599 = vst [vmem:[#allocation2 + $0x48] sm:$0xff] %v583_v35 }
 0x25b   :  { %600 = vst [vmem:[#allocation2 + $0x50] sm:$0xff] %v584_v38  ;;  %601 = vst [vmem:[#allocation2 + $0x58] sm:$0xff] %v585_v51 }
 0x25c   :  { %602 = vst [vmem:[#allocation2 + $0x60] sm:$0xff] %v586_v31  ;;  %603 = vst [vmem:[#allocation2 + $0x68] sm:$0xff] %v587_v41 }
 0x25d   :  { %604 = vst [vmem:[#allocation2 + $0x70] sm:$0xff] %v588_v34  ;;  %605 = vst [vmem:[#allocation2 + $0x78] sm:$0xff] %v589_v36 }
 0x25e   :  { %860 = shalt.err (!%p857_p4)
}
 0x25f   :  { %s861_s26 = scalar_lea.hbm %s1219_s5, 2048 }
 0x260   :  { %p862_p5 = scmp.ne.s32.totalorder %s1219_s5, %s861_s26  ;;  %p865_p6 = scmp.lt.u32.totalorder %s861_s26, %s1219_s5 }
 0x262   :  { %p867_p7 = pnand %p865_p6, %p862_p5 }
 0x264   :  { %870 = shalt.err (!%p867_p7)
}
 0x265   :  { %s878_s6 = smov 128   ;;  %s879_s7 = smov 8  }
 0x266   :  { %617 = dma.vmem_to_hbm [thread:$0]  %s1195_s3, 2048, %s1219_s5, [#allocation3], %s878_s6, %s878_s6, %s879_s7  }
 0x267   :  { %871 = dma.done.wait [#allocation3], 2048  }
 0x268   :  { %872 = vsyncadd [#allocation3], 4294965248 }
 0x269   :  { %621 = vsyncpa [#allocation3], 1 }

</bundles_post_ra>
